<compile_context>
chip_gen: v5e
topology: v5e:2x2
jax: 0.10.0
libtpu: 0.0.40
codegen_flags: <defaults>
</compile_context>

<pallas_src>
import functools

import jax
import jax.numpy as jnp
from jax.experimental import pallas as pl
from jax.experimental.pallas import tpu as pltpu

_TARGET_BLOCK_BYTES = 4 << 20   # ~4 MiB x blocks
_HARD_BLOCK_CAP = 16 << 20      # never let a single x block exceed this
_VMEM_LIMIT_CAP = 48 << 20      # safe on v5e/v6e (128 MiB) and v7x (64 MiB) physical VMEM


def _pooling_head_kernel(x_ref, w_ref, b_ref, o_ref, acc_ref, *, inv_l, reduce_axis):
    """Grid = (B-tiles, L-tiles).  L is the trailing reduction axis.

    x_ref   : (tb, tl, K) if reduce_axis == 1 else (tb, K, tl)
    w_ref   : (K, Cpad)        (constant across the grid)
    b_ref   : (1, Cpad) f32    (constant across the grid)
    o_ref   : (tb, Cpad)
    acc_ref : (tb, K) f32 scratch -- running L-sum, persists across L steps.
    """
    l_step = pl.program_id(1)

    @pl.when(l_step == 0)
    def _init():
        acc_ref[...] = jnp.zeros_like(acc_ref)

    acc_ref[...] += jnp.sum(x_ref[...].astype(jnp.float32), axis=reduce_axis)

    @pl.when(l_step == pl.num_programs(1) - 1)
    def _finalize():
        pooled = acc_ref[...] * inv_l              # mean: 1/L applied on the f32 acc
        y = jnp.dot(pooled, w_ref[...], preferred_element_type=jnp.float32)
        o_ref[...] = (y + b_ref[...]).astype(o_ref.dtype)


def _sublane_granule(dtype):
    # f32 -> 8, bf16 -> 16, int8/fp8 -> 32 (packed dtypes pack along sublanes).
    return max(8, 32 // jnp.dtype(dtype).itemsize)


def _pick_tb(B):
    """Full-B block when B <= 8 (always a legal block shape); otherwise a
    multiple of 8 capped at 64, kept <= B//2 so the 'parallel' B axis has at
    least two iterations (keeps both v7x TensorCores busy)."""
    if B <= 8:
        return B
    tb = min(64, B // 2)
    return max(8, (tb // 8) * 8)


def _plan_kl(B, K, L, itemsize, tb_req, tl_req):
    """Tile plan for the no-transpose (B, K, L) layout (L on lanes).
    Returns (tb, tl) or None if this layout can't be tiled cleanly/cheaply."""
    tb0 = _pick_tb(B) if tb_req is None else tb_req
    candidates = [tb0] + ([8] if (tb_req is None and tb0 > 8) else [])
    for tb in candidates:
        row = tb * K * itemsize                       # bytes per unit of L in a block
        if tl_req is not None:
            ok = (L % tl_req == 0) and (tl_req == L or tl_req % 128 == 0)
            if ok and row * tl_req <= _HARD_BLOCK_CAP:
                return tb, tl_req
            continue
        tl_cap = max(1, _TARGET_BLOCK_BYTES // max(1, row))
        if L <= tl_cap:
            return tb, L                              # single L block (full dim: legal)
        if L % 128 == 0 and tl_cap >= 128:
            tl = min(L, (tl_cap // 128) * 128)
            while tl >= 128 and L % tl != 0:
                tl -= 128
            if tl >= 128:
                return tb, tl
        if row * L <= _HARD_BLOCK_CAP:
            return tb, L                              # one big (but bounded) L block
    return None


def _plan_lk(L, tb, K, itemsize, granule, tl_req):
    """Tile plan for the transposed (B, L, K) layout (K on lanes).
    Returns (tl, L_pad); L is zero-padded up to a multiple of tl if needed."""
    if tl_req is None:
        row = tb * K * itemsize
        tl_cap = max(granule, _TARGET_BLOCK_BYTES // max(1, row))
        tl = max(granule, (min(L, tl_cap) // granule) * granule)
    else:
        tl = tl_req
    if tl >= L:
        return L, L
    l_pad = -(-L // tl) * tl
    return tl, l_pad


def pooling_head(x, weight, bias, *, tb=None, tl=None, layout=None):
    """PoolingHead forward.

    x:      (B, n_vars, d_model, L)
    weight: (n_classes, n_vars * d_model)   (torch nn.Linear layout)
    bias:   (n_classes,)
    returns (B, n_classes) = mean(x, -1).flatten(1) @ weight.T + bias
    Dropout (head_dropout=0) is identity at inference and not emitted.
    """
    B, V, D, L = x.shape
    C = weight.shape[0]
    K = V * D
    itemsize = jnp.dtype(x.dtype).itemsize
    granule = _sublane_granule(x.dtype)

    # Layout choice: skip the materialized transpose whenever the natural
    # innermost run (L) is already a DMA-friendly (>= ~512B) contiguous stretch.
    if layout is None:
        layout = "kl" if L * itemsize >= 512 else "lk"

    plan = None
    if layout == "kl":
        plan = _plan_kl(B, K, L, itemsize, tb, tl)
        if plan is None:
            layout = "lk"

    if layout == "kl":
        tb_, tl_ = plan
        l_pad = L
        x_in = x.reshape(B, K, L)                     # free: contiguous dim collapse
        x_block = (tb_, K, tl_)
        x_index = lambda i, j: (i, 0, j)
        reduce_axis = 2
    else:
        tb_ = _pick_tb(B) if tb is None else tb
        tl_, l_pad = _plan_lk(L, tb_, K, itemsize, granule, tl)
        # Wrapper-side relayout for small L: lane-dense K on the last axis.
        x_in = jnp.transpose(x, (0, 3, 1, 2)).reshape(B, L, K)
        if l_pad != L:
            # Zero rows do not change the L-sum; the 1/L scale uses the true L.
            x_in = jnp.pad(x_in, ((0, 0), (0, l_pad - L), (0, 0)))
        x_block = (tb_, tl_, K)
        x_index = lambda i, j: (i, j, 0)
        reduce_axis = 1

    # Weights: (C, K) -> (K, Cpad), zero-padded so output stores are lane-dense
    # and unmasked.  No 1/L fold, no re-cast (low-precision weights stay exact).
    c_pad = max(128, ((C + 127) // 128) * 128)
    w_kc = jnp.pad(weight.T, ((0, 0), (0, c_pad - C)))
    b_pad = jnp.pad(bias.astype(jnp.float32), (0, c_pad - C)).reshape(1, c_pad)

    grid = (pl.cdiv(B, tb_), l_pad // tl_)
    kernel = functools.partial(_pooling_head_kernel,
                               inv_l=1.0 / float(L), reduce_axis=reduce_axis)

    def _run(single_buffer_consts):
        # Grid-invariant weight / bias blocks: one VMEM buffer is enough.
        const_kwargs = (dict(pipeline_mode=pl.Buffered(1))
                        if single_buffer_consts else {})
        w_bufs = 1 if single_buffer_consts else 2

        x_block_bytes = tb_ * K * tl_ * itemsize
        w_bytes = K * c_pad * jnp.dtype(w_kc.dtype).itemsize
        bias_bytes = c_pad * 4
        out_block_bytes = tb_ * c_pad * itemsize
        acc_bytes = tb_ * K * 4
        need = (2 * x_block_bytes + w_bufs * (w_bytes + bias_bytes)
                + 2 * out_block_bytes + acc_bytes)
        vmem_limit = max(16 << 20, min(_VMEM_LIMIT_CAP, int(need * 1.5) + (2 << 20)))

        call = pl.pallas_call(
            kernel,
            out_shape=jax.ShapeDtypeStruct((B, c_pad), x.dtype),
            grid_spec=pltpu.PrefetchScalarGridSpec(
                num_scalar_prefetch=0,
                grid=grid,
                in_specs=[
                    pl.BlockSpec(x_block, x_index),
                    pl.BlockSpec((K, c_pad), lambda i, j: (0, 0), **const_kwargs),
                    pl.BlockSpec((1, c_pad), lambda i, j: (0, 0), **const_kwargs),
                ],
                out_specs=pl.BlockSpec((tb_, c_pad), lambda i, j: (i, 0)),
                scratch_shapes=[pltpu.VMEM((tb_, K), jnp.float32)],
            ),
            compiler_params=pltpu.CompilerParams(
                dimension_semantics=("parallel", "arbitrary"),
                vmem_limit_bytes=vmem_limit,
            ),
        )
        return call(x_in, w_kc, b_pad)

    # TODO(synk): when B yields a single B-tile, the "parallel" axis has one
    # iteration and a second v7x TensorCore idles; splitting L across cores
    # would need a cross-core partial-sum combine and is not done here.
    try:
        out = _run(True)
    except Exception:
        # pl.Buffered(1) / pipeline_mode unsupported on this jax version:
        # fall back to default (double-buffered) constant blocks.
        out = _run(False)

    # Drop class padding outside the kernel.
    return out[:, :C]


def pooling_head_ref(x, weight, bias):
    pooled = jnp.mean(x.astype(jnp.float32), axis=-1)       # (B, V, D)
    flat = pooled.reshape(pooled.shape[0], -1)               # (B, V*D)
    return flat @ weight.astype(jnp.float32).T + bias.astype(jnp.float32)


if __name__ == "__main__":
    key = jax.random.PRNGKey(0)
    kx1, kx2, kw, kb = jax.random.split(key, 4)

    # Shapes consistent with PoolingHead(n_vars=4, d_model=32, n_classes=8).
    B, V, D, C = 2, 4, 32, 8
    weight = jax.random.normal(kw, (C, V * D), dtype=jnp.float32) * 0.02
    bias = jax.random.normal(kb, (C,), dtype=jnp.float32) * 0.02

    # Case 1: small L -> transposed (K-on-lanes) path; tl=8 forces 2 L-steps so
    # the accumulator init / finalize path is exercised.
    L1 = 16
    x1 = jax.random.normal(kx1, (B, V, D, L1), dtype=jnp.float32)
    out1 = jax.block_until_ready(pooling_head(x1, weight, bias, tl=8))
    ref1 = pooling_head_ref(x1, weight, bias)
    assert out1.shape == (B, C)
    assert jnp.allclose(out1, ref1, atol=1e-4, rtol=1e-4), "mismatch (small-L path)"

    # Case 2: larger L -> no-transpose (L-on-lanes) path; tl=128 forces 2 L-steps.
    L2 = 256
    x2 = jax.random.normal(kx2, (B, V, D, L2), dtype=jnp.float32)
    out2 = jax.block_until_ready(pooling_head(x2, weight, bias, tl=128))
    ref2 = pooling_head_ref(x2, weight, bias)
    assert out2.shape == (B, C)
    assert jnp.allclose(out2, ref2, atol=1e-4, rtol=1e-4), "mismatch (large-L path)"

    print("KERNEL_OK")
</pallas_src>

<mosaic_0001>
module attributes {stable_mosaic.version = 11 : i64} {
  func.func @_pooling_head_kernel(%arg0: i32, %arg1: i32, %arg2: memref<2x8x128xf32, #tpu.memory_space<vmem>>, %arg3: memref<128x128xf32, #tpu.memory_space<vmem>>, %arg4: memref<1x128xf32, #tpu.memory_space<vmem>>, %arg5: memref<2x128xf32, #tpu.memory_space<vmem>>, %arg6: memref<2x128xf32, #tpu.memory_space<vmem>>) attributes {dimension_semantics = [#tpu.dimension_semantics<parallel>, #tpu.dimension_semantics<arbitrary>], iteration_bounds = array<i64: 1, 2>, scalar_prefetch = 0 : i64, scratch_operands = 1 : i64, tpu.core_type = #tpu.core_type<tc>, window_params = [{transform_indices = @transform_0, window_bounds = array<i64: 2, 8, 128>}, {pipeline_mode = #tpu.pipeline_mode<synchronous>, transform_indices = @transform_1, window_bounds = array<i64: 128, 128>}, {pipeline_mode = #tpu.pipeline_mode<synchronous>, transform_indices = @transform_2, window_bounds = array<i64: 1, 128>}, {transform_indices = @transform_3, window_bounds = array<i64: 2, 128>}]} {
    %c0_i32 = arith.constant 0 : i32
    %0 = arith.cmpi eq, %arg1, %c0_i32 : i32
    %1 = arith.extui %0 : i1 to i32
    %c0_i32_0 = arith.constant 0 : i32
    %2 = arith.cmpi ne, %1, %c0_i32_0 : i32
    scf.if %2 {
      %cst_8 = arith.constant 0.000000e+00 : f32
      %11 = vector.broadcast %cst_8 : f32 to vector<2x128xf32>
      %c0_9 = arith.constant 0 : index
      %c0_10 = arith.constant 0 : index
      %12 = vector.load %arg6[%c0_9, %c0_10] : memref<2x128xf32, #tpu.memory_space<vmem>>, vector<2x128xf32>
      tpu.vector_store %arg6[%c0_9, %c0_10], %11 {strides = array<i32>} : memref<2x128xf32, #tpu.memory_space<vmem>>, vector<2x128xf32>,
    } else {
    }
    %c0 = arith.constant 0 : index
    %c0_1 = arith.constant 0 : index
    %3 = vector.load %arg6[%c0, %c0_1] : memref<2x128xf32, #tpu.memory_space<vmem>>, vector<2x128xf32>
    %c0_2 = arith.constant 0 : index
    %c0_3 = arith.constant 0 : index
    %c0_4 = arith.constant 0 : index
    %4 = vector.load %arg2[%c0_2, %c0_3, %c0_4] : memref<2x8x128xf32, #tpu.memory_space<vmem>>, vector<2x8x128xf32>
    %cst = arith.constant dense<0.000000e+00> : vector<2x128xf32>
    %5 = vector.multi_reduction <add>, %4, %cst [1] : vector<2x8x128xf32> to vector<2x128xf32>
    %6 = arith.addf %3, %5 : vector<2x128xf32>
    %c0_5 = arith.constant 0 : index
    %c0_6 = arith.constant 0 : index
    %7 = vector.load %arg6[%c0_5, %c0_6] : memref<2x128xf32, #tpu.memory_space<vmem>>, vector<2x128xf32>
    tpu.vector_store %arg6[%c0_5, %c0_6], %6 {strides = array<i32>} : memref<2x128xf32, #tpu.memory_space<vmem>>, vector<2x128xf32>,
    %c1_i32 = arith.constant 1 : i32
    %8 = arith.cmpi eq, %arg1, %c1_i32 : i32
    %9 = arith.extui %8 : i1 to i32
    %c0_i32_7 = arith.constant 0 : i32
    %10 = arith.cmpi ne, %9, %c0_i32_7 : i32
    scf.if %10 {
      %c0_8 = arith.constant 0 : index
      %c0_9 = arith.constant 0 : index
      %11 = vector.load %arg6[%c0_8, %c0_9] : memref<2x128xf32, #tpu.memory_space<vmem>>, vector<2x128xf32>
      %cst_10 = arith.constant 6.250000e-02 : f32
      %12 = vector.broadcast %cst_10 : f32 to vector<2x128xf32>
      %13 = arith.mulf %11, %12 : vector<2x128xf32>
      %c0_11 = arith.constant 0 : index
      %c0_12 = arith.constant 0 : index
      %14 = vector.load %arg3[%c0_11, %c0_12] : memref<128x128xf32, #tpu.memory_space<vmem>>, vector<128x128xf32>
      %cst_13 = arith.constant dense<0.000000e+00> : vector<2x128xf32>
      %15 = tpu.matmul %13, %14, %cst_13 {dimension_numbers = #tpu.dot_dimension_numbers<[1], [0], [0], [1], [0, 0, 1, 1], [], []>} : vector<2x128xf32>, vector<128x128xf32>, vector<2x128xf32> -> vector<2x128xf32>
      %c0_14 = arith.constant 0 : index
      %c0_15 = arith.constant 0 : index
      %16 = vector.load %arg4[%c0_14, %c0_15] : memref<1x128xf32, #tpu.memory_space<vmem>>, vector<1x128xf32>
      %17 = vector.broadcast %16 : vector<1x128xf32> to vector<2x128xf32>
      %18 = arith.addf %15, %17 : vector<2x128xf32>
      %c0_16 = arith.constant 0 : index
      %c0_17 = arith.constant 0 : index
      %19 = vector.load %arg5[%c0_16, %c0_17] : memref<2x128xf32, #tpu.memory_space<vmem>>, vector<2x128xf32>
      tpu.vector_store %arg5[%c0_16, %c0_17], %18 {strides = array<i32>} : memref<2x128xf32, #tpu.memory_space<vmem>>, vector<2x128xf32>,
    } else {
    }
    return
  }
  func.func @transform_0(%arg0: i32, %arg1: i32) -> (i32, i32, i32) {
    %c0_i32 = arith.constant 0 : i32
    %c0_i32_0 = arith.constant 0 : i32
    return %arg0, %arg1, %c0_i32 : i32, i32, i32
  }
  func.func @transform_1(%arg0: i32, %arg1: i32) -> (i32, i32) {
    %c0_i32 = arith.constant 0 : i32
    %c0_i32_0 = arith.constant 0 : i32
    %c0_i32_1 = arith.constant 0 : i32
    return %c0_i32, %c0_i32_0 : i32, i32
  }
  func.func @transform_2(%arg0: i32, %arg1: i32) -> (i32, i32) {
    %c0_i32 = arith.constant 0 : i32
    %c0_i32_0 = arith.constant 0 : i32
    %c0_i32_1 = arith.constant 0 : i32
    return %c0_i32, %c0_i32_0 : i32, i32
  }
  func.func @transform_3(%arg0: i32, %arg1: i32) -> (i32, i32) {
    %c0_i32 = arith.constant 0 : i32
    %c0_i32_0 = arith.constant 0 : i32
    return %arg0, %c0_i32 : i32, i32
  }
}

module attributes {stable_mosaic.version = 11 : i64} {
  func.func @_pooling_head_kernel(%arg0: i32, %arg1: i32, %arg2: memref<2x8x128xf32, #tpu.memory_space<vmem>>, %arg3: memref<128x128xf32, #tpu.memory_space<vmem>>, %arg4: memref<1x128xf32, #tpu.memory_space<vmem>>, %arg5: memref<2x128xf32, #tpu.memory_space<vmem>>, %arg6: memref<2x128xf32, #tpu.memory_space<vmem>>) attributes {dimension_semantics = [#tpu.dimension_semantics<parallel>, #tpu.dimension_semantics<arbitrary>], iteration_bounds = array<i64: 1, 2>, scalar_prefetch = 0 : i64, scratch_operands = 1 : i64, tpu.core_type = #tpu.core_type<tc>, window_params = [{transform_indices = @transform_0, window_bounds = array<i64: 2, 8, 128>}, {pipeline_mode = #tpu.pipeline_mode<synchronous>, transform_indices = @transform_1, window_bounds = array<i64: 128, 128>}, {pipeline_mode = #tpu.pipeline_mode<synchronous>, transform_indices = @transform_2, window_bounds = array<i64: 1, 128>}, {transform_indices = @transform_3, window_bounds = array<i64: 2, 128>}]} {
    %c0_i32 = arith.constant 0 : i32
    %0 = arith.cmpi eq, %arg1, %c0_i32 : i32
    %1 = arith.extui %0 : i1 to i32
    %c0_i32_0 = arith.constant 0 : i32
    %2 = arith.cmpi ne, %1, %c0_i32_0 : i32
    scf.if %2 {
      %cst_8 = arith.constant 0.000000e+00 : f32
      %11 = vector.broadcast %cst_8 : f32 to vector<2x128xf32>
      %c0_9 = arith.constant 0 : index
      %c0_10 = arith.constant 0 : index
      %12 = vector.load %arg6[%c0_9, %c0_10] : memref<2x128xf32, #tpu.memory_space<vmem>>, vector<2x128xf32>
      tpu.vector_store %arg6[%c0_9, %c0_10], %11 {strides = array<i32>} : memref<2x128xf32, #tpu.memory_space<vmem>>, vector<2x128xf32>,
    } else {
    }
    %c0 = arith.constant 0 : index
    %c0_1 = arith.constant 0 : index
    %3 = vector.load %arg6[%c0, %c0_1] : memref<2x128xf32, #tpu.memory_space<vmem>>, vector<2x128xf32>
    %c0_2 = arith.constant 0 : index
    %c0_3 = arith.constant 0 : index
    %c0_4 = arith.constant 0 : index
    %4 = vector.load %arg2[%c0_2, %c0_3, %c0_4] : memref<2x8x128xf32, #tpu.memory_space<vmem>>, vector<2x8x128xf32>
    %cst = arith.constant dense<0.000000e+00> : vector<2x128xf32>
    %5 = vector.multi_reduction <add>, %4, %cst [1] : vector<2x8x128xf32> to vector<2x128xf32>
    %6 = arith.addf %3, %5 : vector<2x128xf32>
    %c0_5 = arith.constant 0 : index
    %c0_6 = arith.constant 0 : index
    %7 = vector.load %arg6[%c0_5, %c0_6] : memref<2x128xf32, #tpu.memory_space<vmem>>, vector<2x128xf32>
    tpu.vector_store %arg6[%c0_5, %c0_6], %6 {strides = array<i32>} : memref<2x128xf32, #tpu.memory_space<vmem>>, vector<2x128xf32>,
    %c1_i32 = arith.constant 1 : i32
    %8 = arith.cmpi eq, %arg1, %c1_i32 : i32
    %9 = arith.extui %8 : i1 to i32
    %c0_i32_7 = arith.constant 0 : i32
    %10 = arith.cmpi ne, %9, %c0_i32_7 : i32
    scf.if %10 {
      %c0_8 = arith.constant 0 : index
      %c0_9 = arith.constant 0 : index
      %11 = vector.load %arg6[%c0_8, %c0_9] : memref<2x128xf32, #tpu.memory_space<vmem>>, vector<2x128xf32>
      %cst_10 = arith.constant 6.250000e-02 : f32
      %12 = vector.broadcast %cst_10 : f32 to vector<2x128xf32>
      %13 = arith.mulf %11, %12 : vector<2x128xf32>
      %c0_11 = arith.constant 0 : index
      %c0_12 = arith.constant 0 : index
      %14 = vector.load %arg3[%c0_11, %c0_12] : memref<128x128xf32, #tpu.memory_space<vmem>>, vector<128x128xf32>
      %cst_13 = arith.constant dense<0.000000e+00> : vector<2x128xf32>
      %15 = tpu.matmul %13, %14, %cst_13 {dimension_numbers = #tpu.dot_dimension_numbers<[1], [0], [0], [1], [0, 0, 1, 1], [], []>} : vector<2x128xf32>, vector<128x128xf32>, vector<2x128xf32> -> vector<2x128xf32>
      %c0_14 = arith.constant 0 : index
      %c0_15 = arith.constant 0 : index
      %16 = vector.load %arg4[%c0_14, %c0_15] : memref<1x128xf32, #tpu.memory_space<vmem>>, vector<1x128xf32>
      %17 = vector.broadcast %16 : vector<1x128xf32> to vector<2x128xf32>
      %18 = arith.addf %15, %17 : vector<2x128xf32>
      %c0_16 = arith.constant 0 : index
      %c0_17 = arith.constant 0 : index
      %19 = vector.load %arg5[%c0_16, %c0_17] : memref<2x128xf32, #tpu.memory_space<vmem>>, vector<2x128xf32>
      tpu.vector_store %arg5[%c0_16, %c0_17], %18 {strides = array<i32>} : memref<2x128xf32, #tpu.memory_space<vmem>>, vector<2x128xf32>,
    } else {
    }
    return
  }
  func.func @transform_0(%arg0: i32, %arg1: i32) -> (i32, i32, i32) {
    %c0_i32 = arith.constant 0 : i32
    %c0_i32_0 = arith.constant 0 : i32
    return %arg0, %arg1, %c0_i32 : i32, i32, i32
  }
  func.func @transform_1(%arg0: i32, %arg1: i32) -> (i32, i32) {
    %c0_i32 = arith.constant 0 : i32
    %c0_i32_0 = arith.constant 0 : i32
    %c0_i32_1 = arith.constant 0 : i32
    return %c0_i32, %c0_i32_0 : i32, i32
  }
  func.func @transform_2(%arg0: i32, %arg1: i32) -> (i32, i32) {
    %c0_i32 = arith.constant 0 : i32
    %c0_i32_0 = arith.constant 0 : i32
    %c0_i32_1 = arith.constant 0 : i32
    return %c0_i32, %c0_i32_0 : i32, i32
  }
  func.func @transform_3(%arg0: i32, %arg1: i32) -> (i32, i32) {
    %c0_i32 = arith.constant 0 : i32
    %c0_i32_0 = arith.constant 0 : i32
    return %arg0, %c0_i32 : i32, i32
  }
}

</mosaic_0001>

<bundles_post_ra>
// kernel: tpu_custom_call.1
= control target key start
LH: loop header
LB: loop body
LE: loop exit
PB: predicated region body
PF: predicated region fallthrough
CT: control target
= control target key end

     0   :  { %8 = vsyncpa [#allocation4], 0  ;;  %s768_s0 = inlined_call_operand.hbm [shape: f32[2,16,128], index: 0, kind: input, shape index: {}]   ;;  %s769_s1 = inlined_call_operand.hbm [shape: f32[128,128], index: 1, kind: input, shape index: {}]   ;;  %s770_s2 = inlined_call_operand.vmem [shape: f32[1,128], index: 2, kind: input, shape index: {}]   ;;  %s771_s3 = inlined_call_operand.hbm [shape: f32[2,128], index: 3, kind: output, shape index: {}]  }
   0x1   :  { %10 = vsyncpa [#allocation4 + $0x1], 0 }
   0x2   :  { %11 = vsyncpa [#allocation7], 0 }
   0x3   :  { %12 = vsyncpa [#allocation5], 0  ;;  %s643_s12 = smov 0   ;;  %s645_s13 = smov 0  }
   0x4   :  { %s647_s14 = smov 0   ;;  %s649_s15 = smov 0  }
   0x5   :  { %s651_s16 = smov 0   ;;  %s653_s17 = smov 0  }
   0x6 LB: > { %s376_s18 = sadd.s32 4294967295, %s615_s17   ;;  %p52_p0 = scmp.ne.s32.totalorder %s599_s13, %s595_s12  ;;  %s615_s17 = sphi %s653_s17, %s18_s17   ;;  %s611_s16 = sphi %s651_s16, %s780_s16   ;;  %s607_s15 = sphi %s649_s15, %s779_s15   ;;  %s603_s14 = sphi %s647_s14, %s778_s14   ;;  %s599_s13 = sphi %s645_s13, %s777_s13   ;;  %s595_s12 = sphi %s643_s12, %s776_s12  }
   0x7   : > { %p675_p1 = scmp.eq.s32.totalorder %s376_s18, 0  ;;  %p377_p2 = scmp.ge.s32.totalorder %s615_s17, 1 }
   0x8   : > { %p131_p3 = scmp.lt.s32.totalorder %s615_s17, 3  ;;  %s142_s23 = sshll.u32 %s769_s1, 4  ;;  %s143_s23 = int_to_ptr.hbm [resolvable:$true] %s142_s23 }
   0x9   : > { %p683_p4 = por %p675_p1, %p52_p0  ;;  %s617_s25 = smov [#allocation6]  }
   0xa   : > { %p690_p5 = pnand %p377_p2, %p131_p3  ;;  %s144_s26 = sshll.u32 %s617_s25, 4  ;;  %s145_s26 = int_to_ptr.vmem [resolvable:$true] %s144_s26 }
   0xb   : > { %s618_s27 = smov 128   ;;  %s619_s28 = smov 8  }
   0xc   : > { %p401_p6 = pneg %p690_p5  ;;  %s27_s29 = sadd.s32 1, %s611_s16 }
   0xd   : > { %p28_p8 = scmp.ge.s32.totalorder %s27_s29, 2  ;;  %s39_s30 = sadd.s32 1, %s603_s14 }
   0xe   : > { %p402_p7 = pnand %p401_p6, %p675_p1  ;;  %p46_p9 = scmp.ne.s32.totalorder %s603_s14, %s599_s13 }
   0xf   : > { %p47_p10 = scmp.eq.s32.totalorder %s615_s17, 0  ;;  %s782_s29 = smov (%p28_p8, %s27_s29), 0 }
  0x10   : > { %404 = dma.hbm_to_vmem [thread:$0]  (!%p402_p7), %s143_s23, 2048, %s145_s26, [#allocation7], %s618_s27, %s618_s27, %s619_s28  }
  0x11   : > { %p708_p11 = por %p47_p10, %p46_p9  ;;  %p410_p12 = scmp.lt.s32.totalorder %s615_s17, 2 }
  0x12   : > { %s35_s5 = ssub.s32 %s611_s16, %s782_s29  ;;  %s161_s6 = sand.u32 1, %s603_s14  }
  0x13   : > { %p37_p13 = scmp.eq.s32.totalorder %s35_s5, 0  ;;  %s380_s7 = sshll.u32 %s161_s6, 4 }
  0x14   : > { %s381_s8 = sshll.u32 %s611_s16, 3  ;;  %s165_s22 = scalar_lea.vmem [#allocation3], %s380_s7 }
  0x15   : > { %s718_s9 = scalar_select %p37_p13, %s603_s14, %s39_s30  }
  0x16   : > { %s172_s12 = scalar_lea.hbm %s768_s0, %s381_s8  ;;  %s175_s23 = sshll.u32 %s165_s22, 4  ;;  %s176_s23 = int_to_ptr.vmem [resolvable:$true] %s175_s23 }
  0x17   : > { %s173_s21 = sshll.u32 %s172_s12, 4  ;;  %p406_p0 = pnand %p410_p12, %p708_p11  ;;  %s174_s21 = int_to_ptr.hbm [resolvable:$true] %s173_s21 }
  0x18   : > { %s162_s25 = scalar_lea.sflag [#allocation4], %s161_s6  ;;  %s620_s26 = smov 256  }
  0x19   : > { %408 = dma.hbm_to_vmem [thread:$0]  (!%p406_p0), %s174_s21, 256, %s176_s23, %s162_s25, %s620_s26, %s618_s27, %s619_s28  }
  0x1a   : > { %187 = sbr.rel (%p690_p5) target bundleno = 227 (0xe3), region = 32  ;;  %s189_s30 = sand.u32 (!%p690_p5), 1, %s599_s13  }
  0x1b   : > { %s383_s5 = sshll.u32 (!%p690_p5), %s189_s30, 4  ;;  %s190_s8 = scalar_lea.sflag (!%p690_p5), [#allocation4], %s189_s30 }
  0x1c   : > { %s193_s7 = scalar_lea.vmem (!%p690_p5), [#allocation3], %s383_s5 }
  0x1f   : > { %582 = dma.done.wait (%p683_p4), %s190_s8, 256  }
  0x20   : > { %584 = vsyncadd (%p683_p4), %s190_s8, 4294967040 }
  0x21   : > { %586 = dma.done.wait (%p675_p1), [#allocation7], 2048  }
  0x22   : > { %588 = vsyncadd (%p675_p1), [#allocation7], 4294965248  ;;  %p385_p2 = scmp.ne.s32.totalorder %s607_s15, 0 }
  0x24   : > { %221 = sbr.rel (%p385_p2) target bundleno = 43 (0x2b), region = 44 }
  0x29   : > { %v621_v0 = vmov 0.0  }
  0x2a   : > { %222 = vst [vmem:[#allocation2] sm:$0x3] %v621_v0 }
  0x2b PF: > { %v224_v1 = vld [vmem:[%s193_s7] sm:$0xff]  ;;  %v225_v2 = vld [vmem:[%s193_s7 + $0x8] sm:$0xff]  ;;  %vm240_vm0 = vcmask 1041409   ;;  %p386_p1 = scmp.ne.s32.totalorder %s607_s15, 1 }
  0x2c   : > { %v226_v3 = vrot.slane %v224_v1, 4  ;;  %v232_v4 = vrot.slane %v225_v2, 4 }
  0x2e   : > { %v227_v5 = vadd.f32 %v226_v3, %v224_v1  ;;  %v233_v6 = vadd.f32 %v232_v4, %v225_v2 }
  0x30   : > { %v228_v7 = vrot.slane %v227_v5, 2  ;;  %v234_v8 = vrot.slane %v233_v6, 2 }
  0x31   : > { %v223_v13 = vld [vmem:[#allocation2] sm:$0x3] }
  0x32   : > { %v229_v9 = vadd.f32 %v228_v7, %v227_v5  ;;  %v235_v10 = vadd.f32 %v234_v8, %v233_v6 }
  0x34   : > { %v230_v11 = vrot.slane %v229_v9, 1  ;;  %v236_v12 = vrot.slane %v235_v10, 1 }
  0x36   : > { %v231_v14 = vadd.f32 %v230_v11, %v229_v9  ;;  %v237_v15 = vadd.f32 %v236_v12, %v235_v10 }
  0x37   : > { %248 = sbr.rel (%p386_p1) target bundleno = 221 (0xdd), region = 48 }
  0x38   : > { %v241_v16 = vsel %vm240_vm0, %v237_v15, %v231_v14 }
  0x39   : > { %v243_v17 = vadd.f32 %v241_v16, %v223_v13 }
  0x3b   : > { %244 = vst [vmem:[#allocation2] sm:$0x3] %v243_v17 }
  0x3c   : > { %v266_v18 = vld [vmem:[#allocation6 + $0x78] sm:$0xff]  ;;  %v265_v19 = vld [vmem:[#allocation6 + $0x70] sm:$0xff]  ;;  %v264_v20 = vld [vmem:[#allocation6 + $0x68] sm:$0xff] }
  0x3d   : > { %271 = vmatpush.msra.mxu0 %v266_v18  ;;  %v263_v21 = vld [vmem:[#allocation6 + $0x60] sm:$0xff]  ;;  %v262_v22 = vld [vmem:[#allocation6 + $0x58] sm:$0xff]  ;;  %v261_v23 = vld [vmem:[#allocation6 + $0x50] sm:$0xff] }
  0x3e   : > { %v260_v24 = vld [vmem:[#allocation6 + $0x48] sm:$0xff]  ;;  %v259_v25 = vld [vmem:[#allocation6 + $0x40] sm:$0xff]  ;;  %v258_v26 = vld [vmem:[#allocation6 + $0x38] sm:$0xff] }
  0x3f   : > { %272 = vmatpush.msra.mxu0 %v265_v19  ;;  %v257_v27 = vld [vmem:[#allocation6 + $0x30] sm:$0xff]  ;;  %v256_v28 = vld [vmem:[#allocation6 + $0x28] sm:$0xff]  ;;  %v255_v29 = vld [vmem:[#allocation6 + $0x20] sm:$0xff] }
  0x40   : > { %v254_v30 = vld [vmem:[#allocation6 + $0x18] sm:$0xff]  ;;  %v253_v31 = vld [vmem:[#allocation6 + $0x10] sm:$0xff]  ;;  %v252_v33 = vld [vmem:[#allocation6 + $0x8] sm:$0xff] }
  0x41   : > { %273 = vmatpush.msra.mxu0 %v264_v20  ;;  %v251_v34 = vld [vmem:[#allocation6] sm:$0xff]  ;;  %v468_v36 = vld [vmem:[%s770_s2] ss:$0 sm:$0xff] }
  0x42   : > { %v249_v32 = vld [vmem:[#allocation2] sm:$0x3] }
  0x43   : > { %274 = vmatpush.msra.mxu0 %v263_v21  ;;  %v250_v35 = vmul.f32 0.0625, %v249_v32 }
  0x45   : > { %275 = vmatpush.msra.mxu0 %v262_v22 }
  0x47   : > { %276 = vmatpush.msra.mxu0 %v261_v23 }
  0x49   : > { %277 = vmatpush.msra.mxu0 %v260_v24 }
  0x4b   : > { %278 = vmatpush.msra.mxu0 %v259_v25 }
  0x4d   : > { %279 = vmatpush.msra.mxu0 %v258_v26 }
  0x4f   : > { %280 = vmatpush.msra.mxu0 %v257_v27 }
  0x51   : > { %281 = vmatpush.msra.mxu0 %v256_v28 }
  0x53   : > { %282 = vmatpush.msra.mxu0 %v255_v29 }
  0x55   : > { %283 = vmatpush.msra.mxu0 %v254_v30 }
  0x57   : > { %284 = vmatpush.msra.mxu0 %v253_v31 }
  0x59   : > { %285 = vmatpush.msra.mxu0 %v252_v33 }
  0x5b   : > { %286 = vmatpush.msra.mxu0 %v251_v34 }
  0x5c   : > { %287 = vmatmul.f32.vlgmr.msra.gmra.mxu0 %v250_v35 }
  0xd9   : > { %v288_v37 = vpop.f32.mrf.mxu0 }
  0xda   : > { %v289_v38 = vadd.f32 %v468_v36, %v288_v37 }
  0xdc   : > { %291 = vst [vmem:[#allocation8] sm:$0x3] %v289_v38 }
  0xdd PF: > { %p412_p3 = scmp.eq.s32.totalorder %s376_s18, 1  ;;  %s302_s27 = sshll.u32 %s771_s3, 4  ;;  %s303_s27 = int_to_ptr.hbm [resolvable:$true] %s302_s27 }
  0xde   : > { %s622_s28 = smov [#allocation8]  }
  0xdf   : > { %s300_s4 = sshll.u32 %s622_s28, 4  ;;  %s301_s4 = int_to_ptr.vmem [resolvable:$true] %s300_s4 }
  0xe0   : > { %398 = dma.vmem_to_hbm [thread:$0]  (%p412_p3), %s301_s4, 32, %s303_s27, [#allocation5]  }
  0xe1   : > { %590 = dma.done.wait (%p412_p3), [#allocation5], 32  }
  0xe2   : > { %592 = vsyncadd (%p412_p3), [#allocation5], 4294967264 }
  0xe3 PF: > { %s18_s17 = sadd.s32 1, %s615_s17   ;;  %s776_s12 = smov %s599_s13 }
  0xe4   : > { %p15_p4 = scmp.ge.s32.totalorder %s18_s17, 4   ;;  %s777_s13 = smov %s603_s14 }
  0xe5   : > { %s778_s14 = smov %s718_s9  ;;  %s779_s15 = smov %s611_s16 }
  0xe6   : > { %s780_s16 = smov %s782_s29  ;;  %17 = sbr.rel (!%p15_p4) target bundleno = 6 (0x6), region = 82 }
  0xeb   :  { %316 = vsyncpa [#allocation4], 1 }
  0xec   :  { %318 = vsyncpa [#allocation4 + $0x1], 1 }
  0xed   :  { %319 = vsyncpa [#allocation7], 1 }
  0xee   :  { %320 = vsyncpa [#allocation5], 1 }
  0xef   :  { %322 = vsyncpa [#allocation5 + $0x1], 1 }

// kernel: tpu_custom_call.1
= control target key start
LH: loop header
LB: loop body
LE: loop exit
PB: predicated region body
PF: predicated region fallthrough
CT: control target
= control target key end

     0   :  { %8 = vsyncpa [#allocation4], 0  ;;  %s768_s0 = inlined_call_operand.hbm [shape: f32[2,16,128], index: 0, kind: input, shape index: {}]   ;;  %s769_s1 = inlined_call_operand.hbm [shape: f32[128,128], index: 1, kind: input, shape index: {}]   ;;  %s770_s2 = inlined_call_operand.vmem [shape: f32[1,128], index: 2, kind: input, shape index: {}]   ;;  %s771_s3 = inlined_call_operand.hbm [shape: f32[2,128], index: 3, kind: output, shape index: {}]  }
   0x1   :  { %10 = vsyncpa [#allocation4 + $0x1], 0 }
   0x2   :  { %11 = vsyncpa [#allocation7], 0 }
   0x3   :  { %12 = vsyncpa [#allocation5], 0  ;;  %s643_s12 = smov 0   ;;  %s645_s13 = smov 0  }
   0x4   :  { %s647_s14 = smov 0   ;;  %s649_s15 = smov 0  }
   0x5   :  { %s651_s16 = smov 0   ;;  %s653_s17 = smov 0  }
   0x6 LB: > { %s376_s18 = sadd.s32 4294967295, %s615_s17   ;;  %p52_p0 = scmp.ne.s32.totalorder %s599_s13, %s595_s12  ;;  %s615_s17 = sphi %s653_s17, %s18_s17   ;;  %s611_s16 = sphi %s651_s16, %s780_s16   ;;  %s607_s15 = sphi %s649_s15, %s779_s15   ;;  %s603_s14 = sphi %s647_s14, %s778_s14   ;;  %s599_s13 = sphi %s645_s13, %s777_s13   ;;  %s595_s12 = sphi %s643_s12, %s776_s12  }
   0x7   : > { %p675_p1 = scmp.eq.s32.totalorder %s376_s18, 0  ;;  %p377_p2 = scmp.ge.s32.totalorder %s615_s17, 1 }
   0x8   : > { %p131_p3 = scmp.lt.s32.totalorder %s615_s17, 3  ;;  %s142_s23 = sshll.u32 %s769_s1, 4  ;;  %s143_s23 = int_to_ptr.hbm [resolvable:$true] %s142_s23 }
   0x9   : > { %p683_p4 = por %p675_p1, %p52_p0  ;;  %s617_s25 = smov [#allocation6]  }
   0xa   : > { %p690_p5 = pnand %p377_p2, %p131_p3  ;;  %s144_s26 = sshll.u32 %s617_s25, 4  ;;  %s145_s26 = int_to_ptr.vmem [resolvable:$true] %s144_s26 }
   0xb   : > { %s618_s27 = smov 128   ;;  %s619_s28 = smov 8  }
   0xc   : > { %p401_p6 = pneg %p690_p5  ;;  %s27_s29 = sadd.s32 1, %s611_s16 }
   0xd   : > { %p28_p8 = scmp.ge.s32.totalorder %s27_s29, 2  ;;  %s39_s30 = sadd.s32 1, %s603_s14 }
   0xe   : > { %p402_p7 = pnand %p401_p6, %p675_p1  ;;  %p46_p9 = scmp.ne.s32.totalorder %s603_s14, %s599_s13 }
   0xf   : > { %p47_p10 = scmp.eq.s32.totalorder %s615_s17, 0  ;;  %s782_s29 = smov (%p28_p8, %s27_s29), 0 }
  0x10   : > { %404 = dma.hbm_to_vmem [thread:$0]  (!%p402_p7), %s143_s23, 2048, %s145_s26, [#allocation7], %s618_s27, %s618_s27, %s619_s28  }
  0x11   : > { %p708_p11 = por %p47_p10, %p46_p9  ;;  %p410_p12 = scmp.lt.s32.totalorder %s615_s17, 2 }
  0x12   : > { %s35_s5 = ssub.s32 %s611_s16, %s782_s29  ;;  %s161_s6 = sand.u32 1, %s603_s14  }
  0x13   : > { %p37_p13 = scmp.eq.s32.totalorder %s35_s5, 0  ;;  %s380_s7 = sshll.u32 %s161_s6, 4 }
  0x14   : > { %s381_s8 = sshll.u32 %s611_s16, 3  ;;  %s165_s22 = scalar_lea.vmem [#allocation3], %s380_s7 }
  0x15   : > { %s718_s9 = scalar_select %p37_p13, %s603_s14, %s39_s30  }
  0x16   : > { %s172_s12 = scalar_lea.hbm %s768_s0, %s381_s8  ;;  %s175_s23 = sshll.u32 %s165_s22, 4  ;;  %s176_s23 = int_to_ptr.vmem [resolvable:$true] %s175_s23 }
  0x17   : > { %s173_s21 = sshll.u32 %s172_s12, 4  ;;  %p406_p0 = pnand %p410_p12, %p708_p11  ;;  %s174_s21 = int_to_ptr.hbm [resolvable:$true] %s173_s21 }
  0x18   : > { %s162_s25 = scalar_lea.sflag [#allocation4], %s161_s6  ;;  %s620_s26 = smov 256  }
  0x19   : > { %408 = dma.hbm_to_vmem [thread:$0]  (!%p406_p0), %s174_s21, 256, %s176_s23, %s162_s25, %s620_s26, %s618_s27, %s619_s28  }
  0x1a   : > { %187 = sbr.rel (%p690_p5) target bundleno = 227 (0xe3), region = 32  ;;  %s189_s30 = sand.u32 (!%p690_p5), 1, %s599_s13  }
  0x1b   : > { %s383_s5 = sshll.u32 (!%p690_p5), %s189_s30, 4  ;;  %s190_s8 = scalar_lea.sflag (!%p690_p5), [#allocation4], %s189_s30 }
  0x1c   : > { %s193_s7 = scalar_lea.vmem (!%p690_p5), [#allocation3], %s383_s5 }
  0x1f   : > { %582 = dma.done.wait (%p683_p4), %s190_s8, 256  }
  0x20   : > { %584 = vsyncadd (%p683_p4), %s190_s8, 4294967040 }
  0x21   : > { %586 = dma.done.wait (%p675_p1), [#allocation7], 2048  }
  0x22   : > { %588 = vsyncadd (%p675_p1), [#allocation7], 4294965248  ;;  %p385_p2 = scmp.ne.s32.totalorder %s607_s15, 0 }
  0x24   : > { %221 = sbr.rel (%p385_p2) target bundleno = 43 (0x2b), region = 44 }
  0x29   : > { %v621_v0 = vmov 0.0  }
  0x2a   : > { %222 = vst [vmem:[#allocation2] sm:$0x3] %v621_v0 }
  0x2b PF: > { %v224_v1 = vld [vmem:[%s193_s7] sm:$0xff]  ;;  %v225_v2 = vld [vmem:[%s193_s7 + $0x8] sm:$0xff]  ;;  %vm240_vm0 = vcmask 1041409   ;;  %p386_p1 = scmp.ne.s32.totalorder %s607_s15, 1 }
  0x2c   : > { %v226_v3 = vrot.slane %v224_v1, 4  ;;  %v232_v4 = vrot.slane %v225_v2, 4 }
  0x2e   : > { %v227_v5 = vadd.f32 %v226_v3, %v224_v1  ;;  %v233_v6 = vadd.f32 %v232_v4, %v225_v2 }
  0x30   : > { %v228_v7 = vrot.slane %v227_v5, 2  ;;  %v234_v8 = vrot.slane %v233_v6, 2 }
  0x31   : > { %v223_v13 = vld [vmem:[#allocation2] sm:$0x3] }
  0x32   : > { %v229_v9 = vadd.f32 %v228_v7, %v227_v5  ;;  %v235_v10 = vadd.f32 %v234_v8, %v233_v6 }
  0x34   : > { %v230_v11 = vrot.slane %v229_v9, 1  ;;  %v236_v12 = vrot.slane %v235_v10, 1 }
  0x36   : > { %v231_v14 = vadd.f32 %v230_v11, %v229_v9  ;;  %v237_v15 = vadd.f32 %v236_v12, %v235_v10 }
  0x37   : > { %248 = sbr.rel (%p386_p1) target bundleno = 221 (0xdd), region = 48 }
  0x38   : > { %v241_v16 = vsel %vm240_vm0, %v237_v15, %v231_v14 }
  0x39   : > { %v243_v17 = vadd.f32 %v241_v16, %v223_v13 }
  0x3b   : > { %244 = vst [vmem:[#allocation2] sm:$0x3] %v243_v17 }
  0x3c   : > { %v266_v18 = vld [vmem:[#allocation6 + $0x78] sm:$0xff]  ;;  %v265_v19 = vld [vmem:[#allocation6 + $0x70] sm:$0xff]  ;;  %v264_v20 = vld [vmem:[#allocation6 + $0x68] sm:$0xff] }
  0x3d   : > { %271 = vmatpush.msra.mxu0 %v266_v18  ;;  %v263_v21 = vld [vmem:[#allocation6 + $0x60] sm:$0xff]  ;;  %v262_v22 = vld [vmem:[#allocation6 + $0x58] sm:$0xff]  ;;  %v261_v23 = vld [vmem:[#allocation6 + $0x50] sm:$0xff] }
  0x3e   : > { %v260_v24 = vld [vmem:[#allocation6 + $0x48] sm:$0xff]  ;;  %v259_v25 = vld [vmem:[#allocation6 + $0x40] sm:$0xff]  ;;  %v258_v26 = vld [vmem:[#allocation6 + $0x38] sm:$0xff] }
  0x3f   : > { %272 = vmatpush.msra.mxu0 %v265_v19  ;;  %v257_v27 = vld [vmem:[#allocation6 + $0x30] sm:$0xff]  ;;  %v256_v28 = vld [vmem:[#allocation6 + $0x28] sm:$0xff]  ;;  %v255_v29 = vld [vmem:[#allocation6 + $0x20] sm:$0xff] }
  0x40   : > { %v254_v30 = vld [vmem:[#allocation6 + $0x18] sm:$0xff]  ;;  %v253_v31 = vld [vmem:[#allocation6 + $0x10] sm:$0xff]  ;;  %v252_v33 = vld [vmem:[#allocation6 + $0x8] sm:$0xff] }
  0x41   : > { %273 = vmatpush.msra.mxu0 %v264_v20  ;;  %v251_v34 = vld [vmem:[#allocation6] sm:$0xff]  ;;  %v468_v36 = vld [vmem:[%s770_s2] ss:$0 sm:$0xff] }
  0x42   : > { %v249_v32 = vld [vmem:[#allocation2] sm:$0x3] }
  0x43   : > { %274 = vmatpush.msra.mxu0 %v263_v21  ;;  %v250_v35 = vmul.f32 0.0625, %v249_v32 }
  0x45   : > { %275 = vmatpush.msra.mxu0 %v262_v22 }
  0x47   : > { %276 = vmatpush.msra.mxu0 %v261_v23 }
  0x49   : > { %277 = vmatpush.msra.mxu0 %v260_v24 }
  0x4b   : > { %278 = vmatpush.msra.mxu0 %v259_v25 }
  0x4d   : > { %279 = vmatpush.msra.mxu0 %v258_v26 }
  0x4f   : > { %280 = vmatpush.msra.mxu0 %v257_v27 }
  0x51   : > { %281 = vmatpush.msra.mxu0 %v256_v28 }
  0x53   : > { %282 = vmatpush.msra.mxu0 %v255_v29 }
  0x55   : > { %283 = vmatpush.msra.mxu0 %v254_v30 }
  0x57   : > { %284 = vmatpush.msra.mxu0 %v253_v31 }
  0x59   : > { %285 = vmatpush.msra.mxu0 %v252_v33 }
  0x5b   : > { %286 = vmatpush.msra.mxu0 %v251_v34 }
  0x5c   : > { %287 = vmatmul.f32.vlgmr.msra.gmra.mxu0 %v250_v35 }
  0xd9   : > { %v288_v37 = vpop.f32.mrf.mxu0 }
  0xda   : > { %v289_v38 = vadd.f32 %v468_v36, %v288_v37 }
  0xdc   : > { %291 = vst [vmem:[#allocation8] sm:$0x3] %v289_v38 }
  0xdd PF: > { %p412_p3 = scmp.eq.s32.totalorder %s376_s18, 1  ;;  %s302_s27 = sshll.u32 %s771_s3, 4  ;;  %s303_s27 = int_to_ptr.hbm [resolvable:$true] %s302_s27 }
  0xde   : > { %s622_s28 = smov [#allocation8]  }
  0xdf   : > { %s300_s4 = sshll.u32 %s622_s28, 4  ;;  %s301_s4 = int_to_ptr.vmem [resolvable:$true] %s300_s4 }
  0xe0   : > { %398 = dma.vmem_to_hbm [thread:$0]  (%p412_p3), %s301_s4, 32, %s303_s27, [#allocation5]  }
  0xe1   : > { %590 = dma.done.wait (%p412_p3), [#allocation5], 32  }
  0xe2   : > { %592 = vsyncadd (%p412_p3), [#allocation5], 4294967264 }
  0xe3 PF: > { %s18_s17 = sadd.s32 1, %s615_s17   ;;  %s776_s12 = smov %s599_s13 }
  0xe4   : > { %p15_p4 = scmp.ge.s32.totalorder %s18_s17, 4   ;;  %s777_s13 = smov %s603_s14 }
  0xe5   : > { %s778_s14 = smov %s718_s9  ;;  %s779_s15 = smov %s611_s16 }
  0xe6   : > { %s780_s16 = smov %s782_s29  ;;  %17 = sbr.rel (!%p15_p4) target bundleno = 6 (0x6), region = 82 }
  0xeb   :  { %316 = vsyncpa [#allocation4], 1 }
  0xec   :  { %318 = vsyncpa [#allocation4 + $0x1], 1 }
  0xed   :  { %319 = vsyncpa [#allocation7], 1 }
  0xee   :  { %320 = vsyncpa [#allocation5], 1 }
  0xef   :  { %322 = vsyncpa [#allocation5 + $0x1], 1 }

</bundles_post_ra>
